<compile_context>
chip_gen: v6e
topology: v6e:2x2x1
jax: 0.10.0
libtpu: 0.0.40
codegen_flags: <defaults>
</compile_context>

<pallas_src>
import jax
import jax.numpy as jnp
from jax.experimental import pallas as pl
from jax.experimental.pallas import tpu as pltpu

INPUT_SIZE = 60
OUTPUT_SIZE = 32
MIN_TILE_ROWS = 1024      # below this, fixed per-step overhead (~0.35us) dominates
SMALL_BATCH_ROWS = 2048   # below this, skip Pallas and let XLA fuse the matmul
_LANE = 128               # f32 lane width: last dim pads to 128 in VMEM
_SUBLANE = 8              # f32 sublane width: batch-tile must be a multiple of 8


def _round_up(n, m):
    return ((n + m - 1) // m) * m


def _tb_max():
    """Generation-dependent cap on tile rows (bigger tiles on 128-MiB chips)."""
    try:
        vmem_bytes = getattr(pltpu.get_tpu_info(), "vmem_capacity_bytes", 128 << 20)
    except Exception:  # very old jax / exotic backend: fall back to the safe cap
        vmem_bytes = 64 << 20
    # v5e/v6e (128 MiB VMEM): 16384-row tiles halve per-step overhead where DMA
    # dominates most.  v7x (64 MiB): stay at 8192.
    return 16384 if vmem_bytes >= (96 << 20) else 8192


def _choose_tile_rows(batch, tb_max):
    # Aim for >=4 grid steps on large batches so input DMA, compute/store and
    # output writeback overlap (and v7x can shard the batch across both
    # TensorCores), while keeping each tile big enough that the fixed per-step
    # overhead stays small.
    tb = _round_up(pl.cdiv(batch, 4), _SUBLANE)
    tb = max(tb, MIN_TILE_ROWS)
    tb = min(tb, tb_max)
    tb = min(tb, _round_up(batch, _SUBLANE))  # never exceed the batch itself
    return tb


def rnd_linear_kernel(x_ref, w_ref, b_ref, o_ref):
    # Hot path: MXU matmul with f32 accumulator + bias add on the VPU.
    acc = jnp.dot(x_ref[...], w_ref[...], preferred_element_type=jnp.float32)
    o_ref[...] = (acc + b_ref[...]).astype(o_ref.dtype)


def rnd_net_forward(x, weight, bias, *, min_pallas_rows=SMALL_BATCH_ROWS,
                    block_rows=None):
    """Forward pass of RNDNet: x @ weight.T + bias.

    x:      [B, 60]  float32
    weight: [32, 60] float32 (PyTorch nn.Linear convention: [out, in])
    bias:   [32]     float32
    returns [B, 32]  float32
    """
    batch = x.shape[0]
    w_t = weight.T                      # [60, 32], lane-dense for the MXU
    b2d = bias.reshape(1, OUTPUT_SIZE)  # 2D for in-kernel broadcast

    # Tiny-batch fast path: fixed pallas_call setup cost would dominate.
    if batch < max(min_pallas_rows, 1):
        return x @ w_t + b2d

    tb_max = _tb_max()
    if block_rows is None:
        tb = _choose_tile_rows(batch, tb_max)
    else:
        tb = min(_round_up(max(block_rows, _SUBLANE), _SUBLANE), tb_max)
    grid = (pl.cdiv(batch, tb),)

    # VMEM budget with 128-lane padding: the (tb, 60) input block and the
    # (tb, 32) output block each occupy tb*128*4 bytes per buffer; both are
    # double-buffered.  Params are a few tens of KB.  Add headroom for
    # internal scratch and clamp to 40 MiB (safe on v7x's 64 MiB VMEM).
    block_bytes = tb * _LANE * 4
    bytes_needed = 2 * block_bytes + 2 * block_bytes + (4 << 20)
    vmem_limit = int(min(max(bytes_needed, 16 << 20), 40 << 20))

    return pl.pallas_call(
        rnd_linear_kernel,
        out_shape=jax.ShapeDtypeStruct((batch, OUTPUT_SIZE), jnp.float32),
        grid=grid,
        in_specs=[
            # Streamed batch tiles; ragged tail handled by edge-block masking.
            pl.BlockSpec((tb, INPUT_SIZE), lambda i: (i, 0)),
            # Constant block index -> weight/bias stay VMEM-resident across
            # the whole grid; no per-tile re-streaming.
            pl.BlockSpec((INPUT_SIZE, OUTPUT_SIZE), lambda i: (0, 0)),
            pl.BlockSpec((1, OUTPUT_SIZE), lambda i: (0, 0)),
        ],
        out_specs=pl.BlockSpec((tb, OUTPUT_SIZE), lambda i: (i, 0)),
        compiler_params=pltpu.CompilerParams(
            dimension_semantics=("parallel",),
            vmem_limit_bytes=vmem_limit,
        ),
    )(x, w_t, b2d)


def init_params(key, input_size=INPUT_SIZE, output_size=OUTPUT_SIZE):
    # Deterministic init mimicking PyTorch nn.Linear default:
    # U(-1/sqrt(in), 1/sqrt(in)) for both weight and bias.
    kw, kb = jax.random.split(key)
    bound = 1.0 / jnp.sqrt(jnp.float32(input_size))
    weight = jax.random.uniform(
        kw, (output_size, input_size), jnp.float32, minval=-bound, maxval=bound
    )
    bias = jax.random.uniform(
        kb, (output_size,), jnp.float32, minval=-bound, maxval=bound
    )
    return weight, bias


if __name__ == "__main__":
    key = jax.random.PRNGKey(0)
    k_x1, k_x2, k_x3, k_p = jax.random.split(key, 4)

    weight, bias = init_params(k_p)

    def ref_fn(x):
        return x @ weight.T + bias

    # 1) Small aligned batch, forced through the Pallas kernel (single tile).
    B1 = 8
    x1 = jax.random.normal(k_x1, (B1, INPUT_SIZE), jnp.float32)
    out1 = jax.block_until_ready(
        rnd_net_forward(x1, weight, bias, min_pallas_rows=0)
    )
    assert out1.shape == (B1, OUTPUT_SIZE)
    assert jnp.allclose(out1, ref_fn(x1), atol=1e-5, rtol=1e-5)

    # 2) Ragged batch with a forced multi-tile grid: exercises the pipelined
    #    multi-step path and edge-block masking at a small shape.
    B2 = 37
    x2 = jax.random.normal(k_x2, (B2, INPUT_SIZE), jnp.float32)
    out2 = jax.block_until_ready(
        rnd_net_forward(x2, weight, bias, min_pallas_rows=0, block_rows=16)
    )
    assert out2.shape == (B2, OUTPUT_SIZE)
    assert jnp.allclose(out2, ref_fn(x2), atol=1e-5, rtol=1e-5)

    # 3) Default dispatch at a tiny batch takes the XLA fast path.
    B3 = 48
    x3 = jax.random.normal(k_x3, (B3, INPUT_SIZE), jnp.float32)
    out3 = jax.block_until_ready(rnd_net_forward(x3, weight, bias))
    assert out3.shape == (B3, OUTPUT_SIZE)
    assert jnp.allclose(out3, ref_fn(x3), atol=1e-5, rtol=1e-5)

    print("KERNEL_OK")
</pallas_src>

<mosaic_0001>
module attributes {stable_mosaic.version = 11 : i64} {
  func.func @rnd_linear_kernel(%arg0: i32, %arg1: memref<8x60xf32, #tpu.memory_space<vmem>>, %arg2: memref<60x32xf32, #tpu.memory_space<vmem>>, %arg3: memref<1x32xf32, #tpu.memory_space<vmem>>, %arg4: memref<8x32xf32, #tpu.memory_space<vmem>>) attributes {dimension_semantics = [#tpu.dimension_semantics<parallel>], iteration_bounds = array<i64: 1>, scalar_prefetch = 0 : i64, scratch_operands = 0 : i64, tpu.core_type = #tpu.core_type<tc>, window_params = [{transform_indices = @transform_0, window_bounds = array<i64: 8, 60>}, {pipeline_mode = #tpu.pipeline_mode<synchronous>, transform_indices = @transform_1, window_bounds = array<i64: 60, 32>}, {pipeline_mode = #tpu.pipeline_mode<synchronous>, transform_indices = @transform_2, window_bounds = array<i64: 1, 32>}, {transform_indices = @transform_3, window_bounds = array<i64: 8, 32>}]} {
    %c0 = arith.constant 0 : index
    %c0_0 = arith.constant 0 : index
    %0 = vector.load %arg1[%c0, %c0_0] : memref<8x60xf32, #tpu.memory_space<vmem>>, vector<8x60xf32>
    %c0_1 = arith.constant 0 : index
    %c0_2 = arith.constant 0 : index
    %1 = vector.load %arg2[%c0_1, %c0_2] : memref<60x32xf32, #tpu.memory_space<vmem>>, vector<60x32xf32>
    %cst = arith.constant dense<0.000000e+00> : vector<8x32xf32>
    %2 = tpu.matmul %0, %1, %cst {dimension_numbers = #tpu.dot_dimension_numbers<[1], [0], [0], [1], [0, 0, 1, 1], [], []>} : vector<8x60xf32>, vector<60x32xf32>, vector<8x32xf32> -> vector<8x32xf32>
    %c0_3 = arith.constant 0 : index
    %c0_4 = arith.constant 0 : index
    %3 = vector.load %arg3[%c0_3, %c0_4] : memref<1x32xf32, #tpu.memory_space<vmem>>, vector<1x32xf32>
    %4 = vector.broadcast %3 : vector<1x32xf32> to vector<8x32xf32>
    %5 = arith.addf %2, %4 : vector<8x32xf32>
    %c0_5 = arith.constant 0 : index
    %c0_6 = arith.constant 0 : index
    %6 = vector.load %arg4[%c0_5, %c0_6] : memref<8x32xf32, #tpu.memory_space<vmem>>, vector<8x32xf32>
    tpu.vector_store %arg4[%c0_5, %c0_6], %5 {strides = array<i32>} : memref<8x32xf32, #tpu.memory_space<vmem>>, vector<8x32xf32>,
    return
  }
  func.func @transform_0(%arg0: i32) -> (i32, i32) {
    %c0_i32 = arith.constant 0 : i32
    %c0_i32_0 = arith.constant 0 : i32
    return %arg0, %c0_i32 : i32, i32
  }
  func.func @transform_1(%arg0: i32) -> (i32, i32) {
    %c0_i32 = arith.constant 0 : i32
    %c0_i32_0 = arith.constant 0 : i32
    %c0_i32_1 = arith.constant 0 : i32
    return %c0_i32, %c0_i32_0 : i32, i32
  }
  func.func @transform_2(%arg0: i32) -> (i32, i32) {
    %c0_i32 = arith.constant 0 : i32
    %c0_i32_0 = arith.constant 0 : i32
    %c0_i32_1 = arith.constant 0 : i32
    return %c0_i32, %c0_i32_0 : i32, i32
  }
  func.func @transform_3(%arg0: i32) -> (i32, i32) {
    %c0_i32 = arith.constant 0 : i32
    %c0_i32_0 = arith.constant 0 : i32
    return %arg0, %c0_i32 : i32, i32
  }
}

</mosaic_0001>

<bundles_post_ra>
// kernel: tpu_custom_call.1
= control target key start
LH: loop header
LB: loop body
LE: loop exit
PB: predicated region body
PF: predicated region fallthrough
CT: control target
= control target key end

     0   :  { %vm35_vm0 = vcmask 1043456   ;;  %v181_v1 = vmov 0.0   ;;  %vm182_vm1 = vmmov 0   ;;  %s237_s0 = inlined_call_operand.vmem [shape: f32[8,60], index: 0, kind: input, shape index: {}]   ;;  %s238_s1 = inlined_call_operand.vmem [shape: f32[60,32], index: 1, kind: input, shape index: {}]   ;;  %s239_s2 = inlined_call_operand.vmem [shape: f32[1,32], index: 2, kind: input, shape index: {}]   ;;  %s240_s3 = inlined_call_operand.hbm [shape: f32[8,32], index: 3, kind: output, shape index: {}]  }
   0x1   :  { %v23_v0 = vld [vmem:[%s238_s1 + $0x38] sm:$0xf]  ;;  %137 = vmatprep.subr.mxu0 %v181_v1  ;;  %v22_v2 = vld [vmem:[%s238_s1 + $0x30] sm:$0xff]  ;;  %153 = vmatprep.mubr.msk.f32.mxu0 %vm182_vm1, %v181_v1  ;;  %v21_v3 = vld [vmem:[%s238_s1 + $0x28] sm:$0xff] }
   0x2   :  { %138 = vmatpush3.msk.msra.mxu0 %vm35_vm0, %v23_v0 }
   0x3   :  { %139 = vmatprep.subr.mxu0 %v181_v1 }
   0x4   :  { %8 = vsyncpa [#allocation3], 0  ;;  %140 = vmatpush3.msra.mxu0 %v22_v2  ;;  %v20_v4 = vld [vmem:[%s238_s1 + $0x20] sm:$0xff]  ;;  %v19_v5 = vld [vmem:[%s238_s1 + $0x18] sm:$0xff]  ;;  %vm31_vm2 = vcmask 490496   ;;  %s183_s5 = smov [#allocation2]  }
   0x5   :  { %141 = vmatprep.subr.mxu0 %v181_v1  ;;  %v18_v6 = vld [vmem:[%s238_s1 + $0x10] sm:$0xff]  ;;  %v17_v7 = vld [vmem:[%s238_s1 + $0x8] sm:$0xff]  ;;  %v16_v8 = vld [vmem:[%s238_s1] sm:$0xff]  ;;  %s117_s6 = sshll.u32 %s183_s5, 4  ;;  %vm109_vm3 = vcmask 261120   ;;  %s118_s6 = int_to_ptr.vmem [resolvable:$true] %s117_s6 }
   0x6   :  { %142 = vmatpush3.msra.mxu0 %v21_v3  ;;  %v15_v9 = vld [vmem:[%s237_s0] sm:$0xff]  ;;  %s159_s1 = scalar_lea.vmem %s118_s6, 128  ;;  %p164_p1 = scmp.lt.s32.totalorder %s118_s6, %s118_s6 }
   0x7   :  { %143 = vmatprep.subr.mxu0 %v181_v1  ;;  %v125_v10 = vld [vmem:[%s239_s2] ss:$0 sm:$0xff]  ;;  %p160_p0 = scmp.ne.s32.totalorder %s118_s6, %s159_s1  ;;  %p165_p2 = scmp.lt.s32.totalorder %s159_s1, %s159_s1 }
   0x8   :  { %144 = vmatpush3.msra.mxu0 %v20_v4 }
   0x9   :  { %145 = vmatprep.subr.mxu0 %v181_v1  ;;  %p166_p3 = por %p165_p2, %p164_p1 }
   0xa   :  { %146 = vmatpush3.msra.mxu0 %v19_v5 }
   0xb   :  { %147 = vmatprep.subr.mxu0 %v181_v1  ;;  %p167_p4 = pnand %p166_p3, %p160_p0 }
   0xc   :  { %148 = vmatpush3.msra.mxu0 %v18_v6 }
   0xd   :  { %149 = vmatprep.subr.mxu0 %v181_v1 }
   0xe   :  { %150 = vmatpush3.msra.mxu0 %v17_v7 }
   0xf   :  { %151 = vmatprep.subr.mxu0 %v181_v1 }
  0x10   :  { %152 = vmatpush3.msra.mxu0 %v16_v8 }
  0x11   :  { %154 = vmatmul.mubr.msk.f32.vlgmr.msra.gmra.mxu0 %vm31_vm2, %v15_v9 }
  0xd1   :  { %v105_v11 = vpop.f32.mrf.mxu0 }
  0xd2   :  { %v106_v12 = vadd.f32 %v125_v10, %v105_v11 }
  0xd3   :  { %v155_v13 = vpop.f32.mrf.mxu0 }
  0xd4   :  { %110 = vst.msk [vmem:[#allocation2] sm:$0xff] %vm109_vm3, %v106_v12 }
  0xd5   :  { %170 = shalt.err (!%p167_p4)
}
  0xd6   :  { %120 = dma.vmem_to_hbm [thread:$0]  %s118_s6, 128, %s240_s3, [#allocation3]  }
  0xd7   :  { %179 = dma.done.wait [#allocation3], 128  }
  0xd8   :  { %180 = vsyncadd [#allocation3], 4294967168 }
  0xd9   :  { %124 = vsyncpa [#allocation3], 1 }

</bundles_post_ra>
